<compile_context>
chip_gen: v5e
topology: v5e:2x2
jax: 0.10.0
libtpu: 0.0.40
codegen_flags: <defaults>
</compile_context>

<pallas_src>
import jax
import jax.numpy as jnp
from jax.experimental import pallas as pl
from jax.experimental.pallas import tpu as pltpu


# ----------------------------------------------------------------------------
# Kernel
# ----------------------------------------------------------------------------
def groupfc_kernel(x_ref, w_ref, b_ref, o_ref):
    # x_ref: (Bt, Gb * len_group)     -- Gb contiguous channel chunks
    # w_ref: (Gb, len_group, len_classes)
    # b_ref: (1,  Gb * len_classes)
    # o_ref: (Bt, Gb * len_classes)
    gb, len_group, len_classes = w_ref.shape

    if len_classes % 128 == 0 or gb == 1:
        # Per-group fused epilogue: dot -> +bias -> cast -> lane-aligned store.
        # Live data is bounded to one group's (Bt, len_classes) result.
        for g in range(gb):  # static, small unrolled loop
            xg = x_ref[:, g * len_group:(g + 1) * len_group]
            y = jnp.dot(xg, w_ref[g], preferred_element_type=jnp.float32)
            y = y + b_ref[:, g * len_classes:(g + 1) * len_classes].astype(
                jnp.float32)
            o_ref[:, g * len_classes:(g + 1) * len_classes] = y.astype(
                o_ref.dtype)
    else:
        # Unaligned len_classes: concat once and do a single full-block store
        # (avoids many masked partial stores).
        parts = []
        for g in range(gb):
            xg = x_ref[:, g * len_group:(g + 1) * len_group]
            parts.append(
                jnp.dot(xg, w_ref[g], preferred_element_type=jnp.float32))
        y = jnp.concatenate(parts, axis=-1) + b_ref[...].astype(jnp.float32)
        o_ref[...] = y.astype(o_ref.dtype)


# ----------------------------------------------------------------------------
# Tile selection (byte- and VMEM-budget-aware)
# ----------------------------------------------------------------------------
def _choose_batch_tile(B, max_tile=256):
    """Return (Bt, B_padded). Bt divides B_padded and is (8, .)-tile legal."""
    if B <= max_tile:
        return B, B                          # full-extent block: always legal
    best = 0
    for bt in range(8, max_tile + 1, 8):     # largest mult-of-8 divisor of B
        if B % bt == 0:
            best = bt
    if best:
        return best, B
    bt = max_tile - (max_tile % 8)           # no divisor: pad the batch
    return bt, pl.cdiv(B, bt) * bt


def _valid_group_tiles(G, len_group, len_classes):
    tiles = []
    for gb in range(1, G + 1):
        if G % gb:
            continue
        x_ok = (gb * len_group) % 128 == 0 or gb == G
        o_ok = (gb * len_classes) % 128 == 0 or gb == G
        if x_ok and o_ok:
            tiles.append(gb)
    return tiles                             # never empty: contains G


def _choose_group_tile(G, len_group, len_classes, Bt,
                       x_itemsize, w_itemsize, b_itemsize, o_itemsize,
                       target_w_tile_bytes=4 << 20,
                       vmem_budget_bytes=24 << 20):
    """Smallest legal Gb whose weight tile hits the DMA byte target, subject to
    a double-buffered VMEM budget; otherwise the largest that fits."""
    def footprint(gb):                       # double-buffered bytes per step
        xb = Bt * gb * len_group * x_itemsize
        wb = gb * len_group * len_classes * w_itemsize
        bb = gb * len_classes * b_itemsize
        ob = Bt * gb * len_classes * o_itemsize
        return 2 * (xb + wb + bb + ob)

    valid = _valid_group_tiles(G, len_group, len_classes)
    fitting = [gb for gb in valid if footprint(gb) <= vmem_budget_bytes]
    if not fitting:
        return valid[0]                      # caller raises vmem_limit_bytes
    for gb in fitting:
        if gb * len_group * len_classes * w_itemsize >= target_w_tile_bytes:
            return gb
    return fitting[-1]


# ----------------------------------------------------------------------------
# Wrapper
# ----------------------------------------------------------------------------
def group_fc(x, weights, biases, *, groups_per_block=None, batch_block=None,
             out_dtype=None):
    """x: (B, C_prev); weights: (G, len_group, len_classes) (pre-transposed
    nn.Linear weights, any dtype incl. bf16); biases: (G, len_classes).
    Returns (B, G*len_classes)."""
    B, C_prev = x.shape
    G, len_group, len_classes = weights.shape
    assert C_prev == G * len_group
    num_classes = G * len_classes
    out_dtype = out_dtype or x.dtype
    o_itemsize = jnp.dtype(out_dtype).itemsize

    # --- tile selection ------------------------------------------------------
    if batch_block is None:
        Bt, B_pad = _choose_batch_tile(B)
    else:
        Bt, B_pad = batch_block, pl.cdiv(B, batch_block) * batch_block
    if groups_per_block is None:
        Gb = _choose_group_tile(G, len_group, len_classes, Bt,
                                x.dtype.itemsize, weights.dtype.itemsize,
                                biases.dtype.itemsize, o_itemsize)
    else:
        Gb = groups_per_block
    assert G % Gb == 0 and B_pad % Bt == 0

    if B_pad != B:            # hardened batch tiling: pad, don't whole-batch
        x = jnp.pad(x, ((0, B_pad - B), (0, 0)))

    # Flat bias view (1, num_classes): contiguous; order matches output concat.
    b_flat = biases.reshape(1, num_classes)

    # Explicit VMEM limit from the actual double-buffered footprint.
    step_bytes = 2 * (Bt * Gb * len_group * x.dtype.itemsize
                      + Gb * len_group * len_classes * weights.dtype.itemsize
                      + Gb * len_classes * biases.dtype.itemsize
                      + Bt * Gb * len_classes * o_itemsize)
    vmem_limit = int(min(max(32 << 20, int(step_bytes * 1.25) + (1 << 20)),
                         60 << 20))

    cost = pl.CostEstimate(
        flops=2 * B_pad * G * len_group * len_classes,
        transcendentals=0,
        bytes_accessed=(x.size * x.dtype.itemsize
                        + weights.size * weights.dtype.itemsize
                        + b_flat.size * b_flat.dtype.itemsize
                        + B_pad * num_classes * o_itemsize))

    # Group axis OUTERMOST (v7x megacore splits disjoint weight ranges),
    # batch axis INNERMOST (weight block index constant -> no weight re-DMA).
    grid = (G // Gb, B_pad // Bt)
    out = pl.pallas_call(
        groupfc_kernel,
        out_shape=jax.ShapeDtypeStruct((B_pad, num_classes), out_dtype),
        grid=grid,
        in_specs=[
            # x: slice Gb contiguous group-chunks straight out of (B, C_prev)
            pl.BlockSpec((Bt, Gb * len_group), lambda j, i: (i, j)),
            # weights: Gb stacked (len_group, len_classes) tiles
            pl.BlockSpec((Gb, len_group, len_classes), lambda j, i: (j, 0, 0)),
            # bias: matching (1, Gb*len_classes) slice of the flat bias
            pl.BlockSpec((1, Gb * len_classes), lambda j, i: (0, j)),
        ],
        # write directly into the flat (B, num_classes) output — no transpose
        out_specs=pl.BlockSpec((Bt, Gb * len_classes), lambda j, i: (i, j)),
        compiler_params=pltpu.CompilerParams(
            dimension_semantics=("parallel", "arbitrary"),
            vmem_limit_bytes=vmem_limit),
        cost_estimate=cost,
    )(x, weights, b_flat)
    return out[:B] if B_pad != B else out


# ----------------------------------------------------------------------------
# Params + reference
# ----------------------------------------------------------------------------
def init_groupfc_params(key, C_prev, num_classes, num_groups,
                        dtype=jnp.float32):
    """Deterministic init (uniform, like nn.Linear's kaiming-uniform scale).
    Weights stored as (G, in, out) == already-transposed PyTorch Linear weights.
    Pass dtype=jnp.bfloat16 to halve the dominant weight HBM traffic (f32
    accumulation is kept in-kernel)."""
    assert C_prev % num_groups == 0
    assert num_classes % num_groups == 0   # equal groups (see TODO above)
    len_group = C_prev // num_groups
    len_classes = num_classes // num_groups
    kw, kb = jax.random.split(key)
    bound = 1.0 / (len_group ** 0.5)
    weights = jax.random.uniform(
        kw, (num_groups, len_group, len_classes), dtype,
        minval=-bound, maxval=bound)
    biases = jax.random.uniform(
        kb, (num_groups, len_classes), dtype, minval=-bound, maxval=bound)
    return weights, biases


def group_fc_reference(x, weights, biases):
    """Pure-JAX reference mirroring torch.chunk + Linear + cat."""
    G = weights.shape[0]
    chunks = jnp.split(x, G, axis=1)
    outs = [jnp.dot(chunks[g], weights[g],
                    preferred_element_type=jnp.float32) + biases[g]
            for g in range(G)]
    return jnp.concatenate(outs, axis=1).astype(x.dtype)


if __name__ == "__main__":
    # Small, tiling-friendly shapes (len_group = len_classes = 128).
    B = 8
    C_prev = 512
    num_classes = 512
    num_groups = 4

    key = jax.random.PRNGKey(0)
    kx, kp = jax.random.split(key)
    x = jax.random.normal(kx, (B, C_prev), jnp.float32)
    weights, biases = init_groupfc_params(kp, C_prev, num_classes, num_groups)

    out = jax.block_until_ready(group_fc(x, weights, biases))
    ref = group_fc_reference(x, weights, biases)

    assert out.shape == (B, num_classes), out.shape
    err = float(jnp.max(jnp.abs(out - ref)))
    # Tighter than before: catches layout/indexing bugs (O(1) errors) while
    # still allowing for a possible MXU pass-count difference between the
    # Mosaic and XLA lowerings of the f32 dot.
    assert err < 2e-3, f"mismatch vs reference: max abs err {err}"
    print("KERNEL_OK")
</pallas_src>

<mosaic_0001>
module attributes {stable_mosaic.version = 11 : i64} {
  func.func @groupfc_kernel(%arg0: i32, %arg1: i32, %arg2: memref<8x512xf32, #tpu.memory_space<vmem>>, %arg3: memref<4x128x128xf32, #tpu.memory_space<vmem>>, %arg4: memref<1x512xf32, #tpu.memory_space<vmem>>, %arg5: memref<8x512xf32, #tpu.memory_space<vmem>>) attributes {dimension_semantics = [#tpu.dimension_semantics<parallel>, #tpu.dimension_semantics<arbitrary>], iteration_bounds = array<i64: 1, 1>, scalar_prefetch = 0 : i64, scratch_operands = 0 : i64, tpu.core_type = #tpu.core_type<tc>, window_params = [{transform_indices = @transform_0, window_bounds = array<i64: 8, 512>}, {transform_indices = @transform_1, window_bounds = array<i64: 4, 128, 128>}, {transform_indices = @transform_2, window_bounds = array<i64: 1, 512>}, {transform_indices = @transform_3, window_bounds = array<i64: 8, 512>}]} {
    %c0 = arith.constant 0 : index
    %c0_0 = arith.constant 0 : index
    %0 = vector.load %arg2[%c0, %c0_0] : memref<8x512xf32, #tpu.memory_space<vmem>>, vector<8x128xf32>
    %c0_1 = arith.constant 0 : index
    %c0_2 = arith.constant 0 : index
    %c0_3 = arith.constant 0 : index
    %1 = vector.load %arg3[%c0_1, %c0_2, %c0_3] : memref<4x128x128xf32, #tpu.memory_space<vmem>>, vector<1x128x128xf32>
    %2 = vector.shape_cast %1 : vector<1x128x128xf32> to vector<128x128xf32>
    %cst = arith.constant dense<0.000000e+00> : vector<8x128xf32>
    %3 = tpu.matmul %0, %2, %cst {dimension_numbers = #tpu.dot_dimension_numbers<[1], [0], [0], [1], [0, 0, 1, 1], [], []>} : vector<8x128xf32>, vector<128x128xf32>, vector<8x128xf32> -> vector<8x128xf32>
    %c0_4 = arith.constant 0 : index
    %c0_5 = arith.constant 0 : index
    %4 = vector.load %arg4[%c0_4, %c0_5] : memref<1x512xf32, #tpu.memory_space<vmem>>, vector<1x128xf32>
    %5 = vector.broadcast %4 : vector<1x128xf32> to vector<8x128xf32>
    %6 = arith.addf %3, %5 : vector<8x128xf32>
    %c0_6 = arith.constant 0 : index
    %c0_7 = arith.constant 0 : index
    %7 = vector.load %arg5[%c0_6, %c0_7] : memref<8x512xf32, #tpu.memory_space<vmem>>, vector<8x128xf32>
    tpu.vector_store %arg5[%c0_6, %c0_7], %6 {strides = array<i32>} : memref<8x512xf32, #tpu.memory_space<vmem>>, vector<8x128xf32>,
    %c0_8 = arith.constant 0 : index
    %c128 = arith.constant 128 : index
    %8 = vector.load %arg2[%c0_8, %c128] : memref<8x512xf32, #tpu.memory_space<vmem>>, vector<8x128xf32>
    %c1 = arith.constant 1 : index
    %c0_9 = arith.constant 0 : index
    %c0_10 = arith.constant 0 : index
    %9 = vector.load %arg3[%c1, %c0_9, %c0_10] : memref<4x128x128xf32, #tpu.memory_space<vmem>>, vector<1x128x128xf32>
    %10 = vector.shape_cast %9 : vector<1x128x128xf32> to vector<128x128xf32>
    %cst_11 = arith.constant dense<0.000000e+00> : vector<8x128xf32>
    %11 = tpu.matmul %8, %10, %cst_11 {dimension_numbers = #tpu.dot_dimension_numbers<[1], [0], [0], [1], [0, 0, 1, 1], [], []>} : vector<8x128xf32>, vector<128x128xf32>, vector<8x128xf32> -> vector<8x128xf32>
    %c0_12 = arith.constant 0 : index
    %c128_13 = arith.constant 128 : index
    %12 = vector.load %arg4[%c0_12, %c128_13] : memref<1x512xf32, #tpu.memory_space<vmem>>, vector<1x128xf32>
    %13 = vector.broadcast %12 : vector<1x128xf32> to vector<8x128xf32>
    %14 = arith.addf %11, %13 : vector<8x128xf32>
    %c0_14 = arith.constant 0 : index
    %c128_15 = arith.constant 128 : index
    %15 = vector.load %arg5[%c0_14, %c128_15] : memref<8x512xf32, #tpu.memory_space<vmem>>, vector<8x128xf32>
    tpu.vector_store %arg5[%c0_14, %c128_15], %14 {strides = array<i32>} : memref<8x512xf32, #tpu.memory_space<vmem>>, vector<8x128xf32>,
    %c0_16 = arith.constant 0 : index
    %c256 = arith.constant 256 : index
    %16 = vector.load %arg2[%c0_16, %c256] : memref<8x512xf32, #tpu.memory_space<vmem>>, vector<8x128xf32>
    %c2 = arith.constant 2 : index
    %c0_17 = arith.constant 0 : index
    %c0_18 = arith.constant 0 : index
    %17 = vector.load %arg3[%c2, %c0_17, %c0_18] : memref<4x128x128xf32, #tpu.memory_space<vmem>>, vector<1x128x128xf32>
    %18 = vector.shape_cast %17 : vector<1x128x128xf32> to vector<128x128xf32>
    %cst_19 = arith.constant dense<0.000000e+00> : vector<8x128xf32>
    %19 = tpu.matmul %16, %18, %cst_19 {dimension_numbers = #tpu.dot_dimension_numbers<[1], [0], [0], [1], [0, 0, 1, 1], [], []>} : vector<8x128xf32>, vector<128x128xf32>, vector<8x128xf32> -> vector<8x128xf32>
    %c0_20 = arith.constant 0 : index
    %c256_21 = arith.constant 256 : index
    %20 = vector.load %arg4[%c0_20, %c256_21] : memref<1x512xf32, #tpu.memory_space<vmem>>, vector<1x128xf32>
    %21 = vector.broadcast %20 : vector<1x128xf32> to vector<8x128xf32>
    %22 = arith.addf %19, %21 : vector<8x128xf32>
    %c0_22 = arith.constant 0 : index
    %c256_23 = arith.constant 256 : index
    %23 = vector.load %arg5[%c0_22, %c256_23] : memref<8x512xf32, #tpu.memory_space<vmem>>, vector<8x128xf32>
    tpu.vector_store %arg5[%c0_22, %c256_23], %22 {strides = array<i32>} : memref<8x512xf32, #tpu.memory_space<vmem>>, vector<8x128xf32>,
    %c0_24 = arith.constant 0 : index
    %c384 = arith.constant 384 : index
    %24 = vector.load %arg2[%c0_24, %c384] : memref<8x512xf32, #tpu.memory_space<vmem>>, vector<8x128xf32>
    %c3 = arith.constant 3 : index
    %c0_25 = arith.constant 0 : index
    %c0_26 = arith.constant 0 : index
    %25 = vector.load %arg3[%c3, %c0_25, %c0_26] : memref<4x128x128xf32, #tpu.memory_space<vmem>>, vector<1x128x128xf32>
    %26 = vector.shape_cast %25 : vector<1x128x128xf32> to vector<128x128xf32>
    %cst_27 = arith.constant dense<0.000000e+00> : vector<8x128xf32>
    %27 = tpu.matmul %24, %26, %cst_27 {dimension_numbers = #tpu.dot_dimension_numbers<[1], [0], [0], [1], [0, 0, 1, 1], [], []>} : vector<8x128xf32>, vector<128x128xf32>, vector<8x128xf32> -> vector<8x128xf32>
    %c0_28 = arith.constant 0 : index
    %c384_29 = arith.constant 384 : index
    %28 = vector.load %arg4[%c0_28, %c384_29] : memref<1x512xf32, #tpu.memory_space<vmem>>, vector<1x128xf32>
    %29 = vector.broadcast %28 : vector<1x128xf32> to vector<8x128xf32>
    %30 = arith.addf %27, %29 : vector<8x128xf32>
    %c0_30 = arith.constant 0 : index
    %c384_31 = arith.constant 384 : index
    %31 = vector.load %arg5[%c0_30, %c384_31] : memref<8x512xf32, #tpu.memory_space<vmem>>, vector<8x128xf32>
    tpu.vector_store %arg5[%c0_30, %c384_31], %30 {strides = array<i32>} : memref<8x512xf32, #tpu.memory_space<vmem>>, vector<8x128xf32>,
    return
  }
  func.func @transform_0(%arg0: i32, %arg1: i32) -> (i32, i32) {
    %c0_i32 = arith.constant 0 : i32
    return %arg1, %arg0 : i32, i32
  }
  func.func @transform_1(%arg0: i32, %arg1: i32) -> (i32, i32, i32) {
    %c0_i32 = arith.constant 0 : i32
    %c0_i32_0 = arith.constant 0 : i32
    %c0_i32_1 = arith.constant 0 : i32
    return %arg0, %c0_i32, %c0_i32_0 : i32, i32, i32
  }
  func.func @transform_2(%arg0: i32, %arg1: i32) -> (i32, i32) {
    %c0_i32 = arith.constant 0 : i32
    %c0_i32_0 = arith.constant 0 : i32
    return %c0_i32, %arg0 : i32, i32
  }
  func.func @transform_3(%arg0: i32, %arg1: i32) -> (i32, i32) {
    %c0_i32 = arith.constant 0 : i32
    return %arg1, %arg0 : i32, i32
  }
}

</mosaic_0001>

<bundles_post_ra>
// kernel: tpu_custom_call.1
= control target key start
LH: loop header
LB: loop body
LE: loop exit
PB: predicated region body
PF: predicated region fallthrough
CT: control target
= control target key end

     0   :  { %8 = vsyncpa [#allocation3], 0  ;;  %s397_s0 = inlined_call_operand.hbm [shape: f32[8,512], index: 0, kind: input, shape index: {}]   ;;  %s398_s1 = inlined_call_operand.hbm [shape: f32[4,128,128], index: 1, kind: input, shape index: {}]   ;;  %s399_s2 = inlined_call_operand.hbm [shape: f32[1,512], index: 2, kind: input, shape index: {}]   ;;  %s400_s3 = inlined_call_operand.hbm [shape: f32[8,512], index: 3, kind: output, shape index: {}]  }
   0x1   :  { %9 = vsyncpa [#allocation6], 0  ;;  %s26_s14 = sshll.u32 %s398_s1, 4  ;;  %s27_s14 = int_to_ptr.hbm [resolvable:$true] %s26_s14 }
   0x2   :  { %10 = vsyncpa [#allocation4], 0  ;;  %s359_s15 = smov [#allocation5]   ;;  %s16_s19 = sshll.u32 %s397_s0, 4  ;;  %s17_s19 = int_to_ptr.hbm [resolvable:$true] %s16_s19 }
   0x3   :  { %s28_s16 = sshll.u32 %s359_s15, 4  ;;  %s360_s20 = smov 128   ;;  %s29_s16 = int_to_ptr.vmem [resolvable:$true] %s28_s16 }
   0x4   :  { %s361_s21 = smov 8   ;;  %s362_s22 = smov [#allocation2]  }
   0x5   :  { %34 = dma.hbm_to_vmem [thread:$0]  %s27_s14, 8192, %s29_s16, [#allocation6], %s360_s20, %s360_s20, %s361_s21  }
   0x6   :  { %s18_s23 = sshll.u32 %s362_s22, 4  ;;  %s40_s26 = sshll.u32 %s399_s2, 4  ;;  %s19_s23 = int_to_ptr.vmem [resolvable:$true] %s18_s23  ;;  %s41_s26 = int_to_ptr.hbm [resolvable:$true] %s40_s26 }
   0x7   :  { %21 = dma.hbm_to_vmem [thread:$0]  %s17_s19, 512, %s19_s23, [#allocation3]  }
   0x8   :  { %s363_s1 = smov [#allocation7]  }
   0x9   :  { %s42_s27 = sshll.u32 %s363_s1, 4  ;;  %s43_s27 = int_to_ptr.vmem [resolvable:$true] %s42_s27 }
   0xa   :  { %45 = dma.hbm_to_vmem [thread:$0]  %s41_s26, 64, %s43_s27, [#allocation6]  }
   0xb   :  { %353 = dma.done.wait [#allocation3], 512  }
   0xc   :  { %354 = vsyncadd [#allocation3], 4294966784 }
   0xd   :  { %355 = dma.done.wait [#allocation6], 8256  }
   0xe   :  { %356 = vsyncadd [#allocation6], 4294959040  ;;  %v160_v0 = vld [vmem:[#allocation5 + $0x178] sm:$0xff]  ;;  %v159_v2 = vld [vmem:[#allocation5 + $0x170] sm:$0xff]  ;;  %s364_s0 = smov [#allocation8]   ;;  %s236_s30 = sshll.u32 %s400_s3, 4  ;;  %s237_s30 = int_to_ptr.hbm [resolvable:$true] %s236_s30 }
   0xf   :  { %v203_v1 = vld [vmem:[#allocation5 + $0x1f8] sm:$0xff]  ;;  %165 = vmatpush.msra.mxu2 %v160_v0  ;;  %v202_v3 = vld [vmem:[#allocation5 + $0x1f0] sm:$0xff]  ;;  %v158_v4 = vld [vmem:[#allocation5 + $0x168] sm:$0xff]  ;;  %s234_s2 = sshll.u32 %s364_s0, 4  ;;  %s235_s2 = int_to_ptr.vmem [resolvable:$true] %s234_s2 }
  0x10   :  { %208 = vmatpush.msra.mxu3 %v203_v1  ;;  %v201_v5 = vld [vmem:[#allocation5 + $0x1e8] sm:$0xff]  ;;  %v74_v6 = vld [vmem:[#allocation5 + $0x78] sm:$0xff]  ;;  %v73_v8 = vld [vmem:[#allocation5 + $0x70] sm:$0xff] }
  0x11   :  { %v117_v7 = vld [vmem:[#allocation5 + $0xf8] sm:$0xff]  ;;  %166 = vmatpush.msra.mxu2 %v159_v2  ;;  %v116_v9 = vld [vmem:[#allocation5 + $0xf0] sm:$0xff]  ;;  %79 = vmatpush.msra.mxu0 %v74_v6  ;;  %v157_v10 = vld [vmem:[#allocation5 + $0x160] sm:$0xff] }
  0x12   :  { %209 = vmatpush.msra.mxu3 %v202_v3  ;;  %122 = vmatpush.msra.mxu1 %v117_v7  ;;  %v200_v11 = vld [vmem:[#allocation5 + $0x1e0] sm:$0xff]  ;;  %v72_v12 = vld [vmem:[#allocation5 + $0x68] sm:$0xff]  ;;  %v156_v14 = vld [vmem:[#allocation5 + $0x158] sm:$0xff] }
  0x13   :  { %167 = vmatpush.msra.mxu2 %v158_v4  ;;  %v115_v13 = vld [vmem:[#allocation5 + $0xe8] sm:$0xff]  ;;  %80 = vmatpush.msra.mxu0 %v73_v8  ;;  %v199_v15 = vld [vmem:[#allocation5 + $0x1d8] sm:$0xff]  ;;  %v71_v16 = vld [vmem:[#allocation5 + $0x60] sm:$0xff] }
  0x14   :  { %210 = vmatpush.msra.mxu3 %v201_v5  ;;  %123 = vmatpush.msra.mxu1 %v116_v9  ;;  %v114_v17 = vld [vmem:[#allocation5 + $0xe0] sm:$0xff]  ;;  %v155_v18 = vld [vmem:[#allocation5 + $0x150] sm:$0xff]  ;;  %v70_v20 = vld [vmem:[#allocation5 + $0x58] sm:$0xff] }
  0x15   :  { %168 = vmatpush.msra.mxu2 %v157_v10  ;;  %81 = vmatpush.msra.mxu0 %v72_v12  ;;  %v198_v19 = vld [vmem:[#allocation5 + $0x1d0] sm:$0xff]  ;;  %v113_v21 = vld [vmem:[#allocation5 + $0xd8] sm:$0xff]  ;;  %v154_v22 = vld [vmem:[#allocation5 + $0x148] sm:$0xff] }
  0x16   :  { %211 = vmatpush.msra.mxu3 %v200_v11  ;;  %124 = vmatpush.msra.mxu1 %v115_v13  ;;  %v197_v23 = vld [vmem:[#allocation5 + $0x1c8] sm:$0xff]  ;;  %v69_v24 = vld [vmem:[#allocation5 + $0x50] sm:$0xff]  ;;  %v153_v26 = vld [vmem:[#allocation5 + $0x140] sm:$0xff] }
  0x17   :  { %169 = vmatpush.msra.mxu2 %v156_v14  ;;  %82 = vmatpush.msra.mxu0 %v71_v16  ;;  %v112_v25 = vld [vmem:[#allocation5 + $0xd0] sm:$0xff]  ;;  %v196_v27 = vld [vmem:[#allocation5 + $0x1c0] sm:$0xff]  ;;  %v68_v28 = vld [vmem:[#allocation5 + $0x48] sm:$0xff] }
  0x18   :  { %212 = vmatpush.msra.mxu3 %v199_v15  ;;  %125 = vmatpush.msra.mxu1 %v114_v17  ;;  %v111_v29 = vld [vmem:[#allocation5 + $0xc8] sm:$0xff]  ;;  %v152_v30 = vld [vmem:[#allocation5 + $0x138] sm:$0xff]  ;;  %v67_v32 = vld [vmem:[#allocation5 + $0x40] sm:$0xff] }
  0x19   :  { %170 = vmatpush.msra.mxu2 %v155_v18  ;;  %83 = vmatpush.msra.mxu0 %v70_v20  ;;  %v195_v31 = vld [vmem:[#allocation5 + $0x1b8] sm:$0xff]  ;;  %v110_v33 = vld [vmem:[#allocation5 + $0xc0] sm:$0xff]  ;;  %v151_v34 = vld [vmem:[#allocation5 + $0x130] sm:$0xff] }
  0x1a   :  { %213 = vmatpush.msra.mxu3 %v198_v19  ;;  %126 = vmatpush.msra.mxu1 %v113_v21  ;;  %v194_v35 = vld [vmem:[#allocation5 + $0x1b0] sm:$0xff]  ;;  %v66_v36 = vld [vmem:[#allocation5 + $0x38] sm:$0xff]  ;;  %v150_v38 = vld [vmem:[#allocation5 + $0x128] sm:$0xff] }
  0x1b   :  { %171 = vmatpush.msra.mxu2 %v154_v22  ;;  %84 = vmatpush.msra.mxu0 %v69_v24  ;;  %v109_v37 = vld [vmem:[#allocation5 + $0xb8] sm:$0xff]  ;;  %v193_v39 = vld [vmem:[#allocation5 + $0x1a8] sm:$0xff]  ;;  %v65_v40 = vld [vmem:[#allocation5 + $0x30] sm:$0xff] }
  0x1c   :  { %214 = vmatpush.msra.mxu3 %v197_v23  ;;  %127 = vmatpush.msra.mxu1 %v112_v25  ;;  %v108_v41 = vld [vmem:[#allocation5 + $0xb0] sm:$0xff]  ;;  %v149_v42 = vld [vmem:[#allocation5 + $0x120] sm:$0xff]  ;;  %v148_v44 = vld [vmem:[#allocation5 + $0x118] sm:$0xff] }
  0x1d   :  { %172 = vmatpush.msra.mxu2 %v153_v26  ;;  %85 = vmatpush.msra.mxu0 %v68_v28  ;;  %v192_v43 = vld [vmem:[#allocation5 + $0x1a0] sm:$0xff]  ;;  %v64_v45 = vld [vmem:[#allocation5 + $0x28] sm:$0xff]  ;;  %v191_v47 = vld [vmem:[#allocation5 + $0x198] sm:$0xff] }
  0x1e   :  { %215 = vmatpush.msra.mxu3 %v196_v27  ;;  %128 = vmatpush.msra.mxu1 %v111_v29  ;;  %v107_v46 = vld [vmem:[#allocation5 + $0xa8] sm:$0xff]  ;;  %v63_v48 = vld [vmem:[#allocation5 + $0x20] sm:$0xff]  ;;  %v147_v50 = vld [vmem:[#allocation5 + $0x110] sm:$0xff] }
  0x1f   :  { %173 = vmatpush.msra.mxu2 %v152_v30  ;;  %86 = vmatpush.msra.mxu0 %v67_v32  ;;  %v106_v49 = vld [vmem:[#allocation5 + $0xa0] sm:$0xff]  ;;  %v190_v51 = vld [vmem:[#allocation5 + $0x190] sm:$0xff]  ;;  %v62_v52 = vld [vmem:[#allocation5 + $0x18] sm:$0xff] }
  0x20   :  { %216 = vmatpush.msra.mxu3 %v195_v31  ;;  %129 = vmatpush.msra.mxu1 %v110_v33  ;;  %v105_v53 = vld [vmem:[#allocation5 + $0x98] sm:$0xff]  ;;  %v146_v54 = vld [vmem:[#allocation5 + $0x108] sm:$0xff]  ;;  %v61_v56 = vld [vmem:[#allocation5 + $0x10] sm:$0xff] }
  0x21   :  { %174 = vmatpush.msra.mxu2 %v151_v34  ;;  %87 = vmatpush.msra.mxu0 %v66_v36  ;;  %v189_v55 = vld [vmem:[#allocation5 + $0x188] sm:$0xff]  ;;  %v104_v57 = vld [vmem:[#allocation5 + $0x90] sm:$0xff]  ;;  %v145_v58 = vld [vmem:[#allocation5 + $0x100] sm:$0xff] }
  0x22   :  { %217 = vmatpush.msra.mxu3 %v194_v35  ;;  %130 = vmatpush.msra.mxu1 %v109_v37  ;;  %v188_v59 = vld [vmem:[#allocation5 + $0x180] sm:$0xff]  ;;  %v143_v60 = vld [vmem:[#allocation2 + $0x10] sm:$0xff]  ;;  %v186_v61 = vld [vmem:[#allocation2 + $0x18] sm:$0xff] }
  0x23   :  { %175 = vmatpush.msra.mxu2 %v150_v38  ;;  %88 = vmatpush.msra.mxu0 %v65_v40  ;;  %v60_v62 = vld [vmem:[#allocation5 + $0x8] sm:$0xff]  ;;  %v59_v0 = vld [vmem:[#allocation5] sm:$0xff] }
  0x24   :  { %218 = vmatpush.msra.mxu3 %v193_v39  ;;  %131 = vmatpush.msra.mxu1 %v108_v41  ;;  %v103_v63 = vld [vmem:[#allocation5 + $0x88] sm:$0xff]  ;;  %v102_v1 = vld [vmem:[#allocation5 + $0x80] sm:$0xff] }
  0x25   :  { %176 = vmatpush.msra.mxu2 %v149_v42  ;;  %89 = vmatpush.msra.mxu0 %v64_v45  ;;  %v58_v2 = vld [vmem:[#allocation2] sm:$0xff]  ;;  %v100_v3 = vld [vmem:[#allocation2 + $0x8] sm:$0xff] }
  0x26   :  { %219 = vmatpush.msra.mxu3 %v192_v43  ;;  %132 = vmatpush.msra.mxu1 %v107_v46  ;;  %v253_v4 = vld [vmem:[#allocation7] ss:$0 sm:$0xff]  ;;  %v254_v5 = vld [vmem:[#allocation7 + $0x1] ss:$0 sm:$0xff]  ;;  %v255_v6 = vld [vmem:[#allocation7 + $0x2] ss:$0 sm:$0xff] }
  0x27   :  { %177 = vmatpush.msra.mxu2 %v148_v44  ;;  %90 = vmatpush.msra.mxu0 %v63_v48  ;;  %v256_v7 = vld [vmem:[#allocation7 + $0x3] ss:$0 sm:$0xff] }
  0x28   :  { %220 = vmatpush.msra.mxu3 %v191_v47  ;;  %133 = vmatpush.msra.mxu1 %v106_v49 }
  0x29   :  { %178 = vmatpush.msra.mxu2 %v147_v50  ;;  %91 = vmatpush.msra.mxu0 %v62_v52 }
  0x2a   :  { %221 = vmatpush.msra.mxu3 %v190_v51  ;;  %134 = vmatpush.msra.mxu1 %v105_v53 }
  0x2b   :  { %179 = vmatpush.msra.mxu2 %v146_v54  ;;  %92 = vmatpush.msra.mxu0 %v61_v56 }
  0x2c   :  { %222 = vmatpush.msra.mxu3 %v189_v55  ;;  %135 = vmatpush.msra.mxu1 %v104_v57 }
  0x2d   :  { %180 = vmatpush.msra.mxu2 %v145_v58  ;;  %93 = vmatpush.msra.mxu0 %v60_v62 }
  0x2e   :  { %223 = vmatpush.msra.mxu3 %v188_v59  ;;  %181 = vmatmul.f32.vlgmr.msra.gmra.mxu2 %v143_v60 }
  0x2f   :  { %224 = vmatmul.f32.vlgmr.msra.gmra.mxu3 %v186_v61  ;;  %136 = vmatpush.msra.mxu1 %v103_v63 }
  0x30   :  { %94 = vmatpush.msra.mxu0 %v59_v0 }
  0x31   :  { %137 = vmatpush.msra.mxu1 %v102_v1  ;;  %95 = vmatmul.f32.vlgmr.msra.gmra.mxu0 %v58_v2 }
  0x32   :  { %138 = vmatmul.f32.vlgmr.msra.gmra.mxu1 %v100_v3 }
  0xae   :  { %v96_v8 = vpop.f32.mrf.mxu0 }
  0xaf   :  { %v139_v9 = vpop.f32.mrf.mxu1  ;;  %v97_v10 = vadd.f32 %v253_v4, %v96_v8 }
  0xb0   :  { %v140_v11 = vadd.f32 %v254_v5, %v139_v9 }
  0xb1   :  { %v182_v12 = vpop.f32.mrf.mxu2  ;;  %99 = vst [vmem:[#allocation8] sm:$0xff] %v97_v10 }
  0xb2   :  { %v225_v13 = vpop.f32.mrf.mxu3  ;;  %v183_v14 = vadd.f32 %v255_v6, %v182_v12  ;;  %142 = vst [vmem:[#allocation8 + $0x8] sm:$0xff] %v140_v11 }
  0xb3   :  { %v226_v15 = vadd.f32 %v256_v7, %v225_v13 }
  0xb4   :  { %185 = vst [vmem:[#allocation8 + $0x10] sm:$0xff] %v183_v14 }
  0xb5   :  { %228 = vst [vmem:[#allocation8 + $0x18] sm:$0xff] %v226_v15 }
  0xb6   :  { %239 = dma.vmem_to_hbm [thread:$0]  %s235_s2, 512, %s237_s30, [#allocation4]  }
  0xb7   :  { %357 = dma.done.wait [#allocation4], 512  }
  0xb8   :  { %358 = vsyncadd [#allocation4], 4294966784 }
  0xb9   :  { %244 = vsyncpa [#allocation3], 1 }
  0xba   :  { %245 = vsyncpa [#allocation6], 1 }
  0xbb   :  { %246 = vsyncpa [#allocation4], 1 }

</bundles_post_ra>
